<compile_context>
chip_gen: v6e
topology: v6e:2x2x1
jax: 0.10.0
libtpu: 0.0.40
codegen_flags: <defaults>
</compile_context>

<pallas_src>
import math

import jax
import jax.numpy as jnp
from jax.experimental import pallas as pl

# ----------------------------- config ---------------------------------------
B, S, D = 2, 8, 32          # batch, sequence length, d_model (= EncoderLayer.size)
H = 4                       # number of attention heads
DK = D // H                 # per-head dim
DFF = 64                    # feed-forward hidden size
EPS = 1e-6                  # LayerNorm eps (matches module default)


# ----------------------------- kernel ---------------------------------------
def _encoder_layer_kernel(
    x_ref, mask_ref,
    wqkv_ref, bqkv_ref, wo_ref, bo_ref,
    ln1a_ref, ln1b_ref,
    w1_ref, b1_ref, w2_ref, b2_ref,
    ln2a_ref, ln2b_ref,
    o_ref,
):
    f32 = jnp.float32
    x = x_ref[...].astype(f32)                       # (B*S, D) row-flat activations

    def layer_norm(v, a, b):
        # matches torch: mean / unbiased std (N-1), divide by (std + eps)
        mean = jnp.mean(v, axis=-1, keepdims=True)
        c = v - mean
        var = jnp.sum(c * c, axis=-1, keepdims=True) * (1.0 / (D - 1))
        inv = pl.reciprocal(jnp.sqrt(var) + EPS)     # exact; lives on the EUP slot
        return c * (a * inv) + b

    # ---------------- sublayer 0: pre-LN -> self attention -> residual ------
    xn = layer_norm(x, ln1a_ref[...], ln1b_ref[...])                       # (B*S, D)

    # Fused QKV projection: one lane-dense MXU push.
    qkv = jnp.dot(xn, wqkv_ref[...], preferred_element_type=f32) + bqkv_ref[...]  # (B*S, 3*D)

    GH = B * H

    def gather_heads(col0):
        # (B*S, 3*D) -> (B*H, S, DK) via static slices + leading-axis stack
        return jnp.stack(
            [qkv[b * S:(b + 1) * S, col0 + h * DK: col0 + (h + 1) * DK]
             for b in range(B) for h in range(H)],
            axis=0)

    qh = gather_heads(0)           # (B*H, S, DK); 1/sqrt(DK) already folded into wq
    kh = gather_heads(D)
    vh = gather_heads(2 * D)

    scores = jnp.einsum("gqd,gkd->gqk", qh, kh,
                        preferred_element_type=f32)                        # (B*H, S, S)

    # Additive mask bias built in-kernel from the raw int mask (1 = attend).
    bias = (1.0 - mask_ref[...].astype(f32)) * (-1e9)                      # (B, 1, S)
    bias_g = jnp.stack([bias[b] for b in range(B) for _ in range(H)], axis=0)  # (B*H, 1, S)
    scores = scores + bias_g

    m = jnp.max(scores, axis=-1, keepdims=True)
    e = jnp.exp(scores - m)
    p = e * pl.reciprocal(jnp.sum(e, axis=-1, keepdims=True))              # exact reciprocal

    ctx = jnp.einsum("gqk,gkd->gqd", p, vh, preferred_element_type=f32)    # (B*H, S, DK)

    # Re-concatenate heads lane-wise -> (B*S, D), then ONE output projection.
    ctx_flat = jnp.concatenate(
        [jnp.concatenate([ctx[b * H + h] for h in range(H)], axis=-1) for b in range(B)],
        axis=0)                                                            # (B*S, D)
    attn = jnp.dot(ctx_flat, wo_ref[...], preferred_element_type=f32) + bo_ref[...]

    x1 = x + attn                                   # residual (dropout == identity)

    # ---------------- sublayer 1: pre-LN -> feed forward -> residual --------
    x1n = layer_norm(x1, ln2a_ref[...], ln2b_ref[...])
    h1 = jnp.maximum(
        jnp.dot(x1n, w1_ref[...], preferred_element_type=f32) + b1_ref[...], 0.0)
    ff = jnp.dot(h1, w2_ref[...], preferred_element_type=f32) + b2_ref[...]

    o_ref[...] = (x1 + ff).astype(o_ref.dtype)


# ----------------------------- packing (once, outside per-call path) ---------
def pack_params(p):
    """Static weight packing: fold 1/sqrt(DK) into wq/bq, fuse q|k|v columns."""
    scale = 1.0 / math.sqrt(DK)
    return {
        "wqkv": jnp.concatenate([p["wq"] * scale, p["wk"], p["wv"]], axis=1),  # (D, 3*D)
        "bqkv": jnp.concatenate([p["bq"] * scale, p["bk"], p["bv"]], axis=1),  # (1, 3*D)
        "wo": p["wo"], "bo": p["bo"],
        "ln1a": p["ln1a"], "ln1b": p["ln1b"],
        "w1": p["w1"], "b1": p["b1"], "w2": p["w2"], "b2": p["b2"],
        "ln2a": p["ln2a"], "ln2b": p["ln2b"],
    }


# ----------------------------- wrapper ---------------------------------------
@jax.jit
def encoder_layer(x, mask, pp):
    """x: (B, S, D) f32, mask: (B, 1, S) int32 (1 = attend), pp: packed params."""
    x_flat = x.reshape(B * S, D)
    out_flat = pl.pallas_call(
        _encoder_layer_kernel,
        out_shape=jax.ShapeDtypeStruct((B * S, D), x.dtype),
        # single invocation, no grid: every operand lives whole in VMEM (~30 KiB total)
    )(
        x_flat, mask,
        pp["wqkv"], pp["bqkv"], pp["wo"], pp["bo"],
        pp["ln1a"], pp["ln1b"],
        pp["w1"], pp["b1"], pp["w2"], pp["b2"],
        pp["ln2a"], pp["ln2b"],
    )
    return out_flat.reshape(B, S, D)


# ----------------------------- pure-JAX reference ----------------------------
def encoder_layer_ref(x, mask, p):
    def layer_norm(v, a, b):
        mean = jnp.mean(v, axis=-1, keepdims=True)
        std = jnp.sqrt(jnp.sum((v - mean) ** 2, axis=-1, keepdims=True) / (D - 1))
        return a * (v - mean) / (std + EPS) + b

    xn = layer_norm(x, p["ln1a"], p["ln1b"])
    q = xn @ p["wq"] + p["bq"]
    k = xn @ p["wk"] + p["bk"]
    v = xn @ p["wv"] + p["bv"]
    q = q.reshape(B, S, H, DK).transpose(0, 2, 1, 3)
    k = k.reshape(B, S, H, DK).transpose(0, 2, 1, 3)
    v = v.reshape(B, S, H, DK).transpose(0, 2, 1, 3)
    scores = jnp.einsum("bhqd,bhkd->bhqk", q, k) / math.sqrt(DK)
    scores = jnp.where(mask[:, None, :, :] == 0, -1e9, scores)
    pattn = jax.nn.softmax(scores, axis=-1)
    attn = jnp.einsum("bhqk,bhkd->bhqd", pattn, v).transpose(0, 2, 1, 3).reshape(B, S, D)
    attn = attn @ p["wo"] + p["bo"]
    x1 = x + attn
    x1n = layer_norm(x1, p["ln2a"], p["ln2b"])
    ff = jnp.maximum(x1n @ p["w1"] + p["b1"], 0.0) @ p["w2"] + p["b2"]
    return x1 + ff


# ----------------------------- main -------------------------------------------
if __name__ == "__main__":
    root = jax.random.PRNGKey(0)
    keys = jax.random.split(root, 13)

    params = {
        # multi-head attention linears (d_model x d_model, with bias)
        "wq": 0.1 * jax.random.normal(keys[0], (D, D), jnp.float32),
        "bq": 0.01 * jax.random.normal(keys[1], (1, D), jnp.float32),
        "wk": 0.1 * jax.random.normal(keys[2], (D, D), jnp.float32),
        "bk": 0.01 * jax.random.normal(keys[3], (1, D), jnp.float32),
        "wv": 0.1 * jax.random.normal(keys[4], (D, D), jnp.float32),
        "bv": 0.01 * jax.random.normal(keys[5], (1, D), jnp.float32),
        "wo": 0.1 * jax.random.normal(keys[6], (D, D), jnp.float32),
        "bo": 0.01 * jax.random.normal(keys[7], (1, D), jnp.float32),
        # layernorm 1 / 2 (ones / zeros per module init)
        "ln1a": jnp.ones((1, D), jnp.float32),
        "ln1b": jnp.zeros((1, D), jnp.float32),
        "ln2a": jnp.ones((1, D), jnp.float32),
        "ln2b": jnp.zeros((1, D), jnp.float32),
        # position-wise feed forward
        "w1": 0.1 * jax.random.normal(keys[8], (D, DFF), jnp.float32),
        "b1": 0.01 * jax.random.normal(keys[9], (1, DFF), jnp.float32),
        "w2": 0.1 * jax.random.normal(keys[10], (DFF, D), jnp.float32),
        "b2": 0.01 * jax.random.normal(keys[11], (1, D), jnp.float32),
    }

    x = jax.random.normal(keys[12], (B, S, D), jnp.float32)
    # mask: 1 = attend, 0 = masked (mask out the last two keys of batch 1)
    mask = jnp.ones((B, 1, S), jnp.int32)
    mask = mask.at[1, 0, S - 2:].set(0)

    packed = jax.block_until_ready(pack_params(params))   # packed ONCE, reused per call

    out = jax.block_until_ready(encoder_layer(x, mask, packed))
    ref = encoder_layer_ref(x, mask, params)

    assert out.shape == (B, S, D)
    max_err = jnp.max(jnp.abs(out - ref))
    assert jnp.allclose(out, ref, atol=1e-4, rtol=1e-4), f"max abs err {max_err}"
    print("KERNEL_OK")
</pallas_src>

<mosaic_0001>
module attributes {stable_mosaic.version = 11 : i64} {
  func.func @_encoder_layer_kernel(%arg0: memref<16x32xf32, #tpu.memory_space<vmem>>, %arg1: memref<2x1x8xi32, #tpu.memory_space<vmem>>, %arg2: memref<32x96xf32, #tpu.memory_space<vmem>>, %arg3: memref<1x96xf32, #tpu.memory_space<vmem>>, %arg4: memref<32x32xf32, #tpu.memory_space<vmem>>, %arg5: memref<1x32xf32, #tpu.memory_space<vmem>>, %arg6: memref<1x32xf32, #tpu.memory_space<vmem>>, %arg7: memref<1x32xf32, #tpu.memory_space<vmem>>, %arg8: memref<32x64xf32, #tpu.memory_space<vmem>>, %arg9: memref<1x64xf32, #tpu.memory_space<vmem>>, %arg10: memref<64x32xf32, #tpu.memory_space<vmem>>, %arg11: memref<1x32xf32, #tpu.memory_space<vmem>>, %arg12: memref<1x32xf32, #tpu.memory_space<vmem>>, %arg13: memref<1x32xf32, #tpu.memory_space<vmem>>, %arg14: memref<16x32xf32, #tpu.memory_space<vmem>>) attributes {dimension_semantics = [], scalar_prefetch = 0 : i64, scratch_operands = 0 : i64, tpu.core_type = #tpu.core_type<tc>} {
    %c0 = arith.constant 0 : index
    %c0_0 = arith.constant 0 : index
    %0 = vector.load %arg0[%c0, %c0_0] : memref<16x32xf32, #tpu.memory_space<vmem>>, vector<16x32xf32>
    %c0_1 = arith.constant 0 : index
    %c0_2 = arith.constant 0 : index
    %1 = vector.load %arg6[%c0_1, %c0_2] : memref<1x32xf32, #tpu.memory_space<vmem>>, vector<1x32xf32>
    %c0_3 = arith.constant 0 : index
    %c0_4 = arith.constant 0 : index
    %2 = vector.load %arg7[%c0_3, %c0_4] : memref<1x32xf32, #tpu.memory_space<vmem>>, vector<1x32xf32>
    %cst = arith.constant dense<0.000000e+00> : vector<16xf32>
    %3 = vector.multi_reduction <add>, %0, %cst [1] : vector<16x32xf32> to vector<16xf32>
    %4 = vector.shape_cast %3 : vector<16xf32> to vector<16x1xf32>
    %cst_5 = arith.constant 3.200000e+01 : f32
    %5 = vector.broadcast %cst_5 : f32 to vector<16x1xf32>
    %6 = arith.divf %4, %5 : vector<16x1xf32>
    %7 = vector.broadcast %6 : vector<16x1xf32> to vector<16x32xf32>
    %8 = arith.subf %0, %7 : vector<16x32xf32>
    %9 = arith.mulf %8, %8 : vector<16x32xf32>
    %cst_6 = arith.constant dense<0.000000e+00> : vector<16xf32>
    %10 = vector.multi_reduction <add>, %9, %cst_6 [1] : vector<16x32xf32> to vector<16xf32>
    %11 = vector.shape_cast %10 : vector<16xf32> to vector<16x1xf32>
    %cst_7 = arith.constant 0.0322580636 : f32
    %12 = vector.broadcast %cst_7 : f32 to vector<16x1xf32>
    %13 = arith.mulf %11, %12 : vector<16x1xf32>
    %14 = math.sqrt %13 : vector<16x1xf32>
    %cst_8 = arith.constant 9.99999997E-7 : f32
    %15 = vector.broadcast %cst_8 : f32 to vector<16x1xf32>
    %16 = arith.addf %14, %15 : vector<16x1xf32>
    %17 = tpu.reciprocal %16 : vector<16x1xf32> -> vector<16x1xf32>
    %18 = vector.broadcast %1 : vector<1x32xf32> to vector<16x32xf32>
    %19 = vector.broadcast %17 : vector<16x1xf32> to vector<16x32xf32>
    %20 = arith.mulf %18, %19 : vector<16x32xf32>
    %21 = arith.mulf %8, %20 : vector<16x32xf32>
    %22 = vector.broadcast %2 : vector<1x32xf32> to vector<16x32xf32>
    %23 = arith.addf %21, %22 : vector<16x32xf32>
    %c0_9 = arith.constant 0 : index
    %c0_10 = arith.constant 0 : index
    %24 = vector.load %arg2[%c0_9, %c0_10] : memref<32x96xf32, #tpu.memory_space<vmem>>, vector<32x96xf32>
    %cst_11 = arith.constant dense<0.000000e+00> : vector<16x96xf32>
    %25 = tpu.matmul %23, %24, %cst_11 {dimension_numbers = #tpu.dot_dimension_numbers<[1], [0], [0], [1], [0, 0, 1, 1], [], []>} : vector<16x32xf32>, vector<32x96xf32>, vector<16x96xf32> -> vector<16x96xf32>
    %c0_12 = arith.constant 0 : index
    %c0_13 = arith.constant 0 : index
    %26 = vector.load %arg3[%c0_12, %c0_13] : memref<1x96xf32, #tpu.memory_space<vmem>>, vector<1x96xf32>
    %27 = vector.broadcast %26 : vector<1x96xf32> to vector<16x96xf32>
    %28 = arith.addf %25, %27 : vector<16x96xf32>
    %29 = vector.extract_strided_slice %28 {offsets = [0, 0], sizes = [8, 8], strides = [1, 1]} : vector<16x96xf32> to vector<8x8xf32>
    %30 = vector.extract_strided_slice %28 {offsets = [0, 8], sizes = [8, 8], strides = [1, 1]} : vector<16x96xf32> to vector<8x8xf32>
    %31 = vector.extract_strided_slice %28 {offsets = [0, 16], sizes = [8, 8], strides = [1, 1]} : vector<16x96xf32> to vector<8x8xf32>
    %32 = vector.extract_strided_slice %28 {offsets = [0, 24], sizes = [8, 8], strides = [1, 1]} : vector<16x96xf32> to vector<8x8xf32>
    %33 = vector.extract_strided_slice %28 {offsets = [8, 0], sizes = [8, 8], strides = [1, 1]} : vector<16x96xf32> to vector<8x8xf32>
    %34 = vector.extract_strided_slice %28 {offsets = [8, 8], sizes = [8, 8], strides = [1, 1]} : vector<16x96xf32> to vector<8x8xf32>
    %35 = vector.extract_strided_slice %28 {offsets = [8, 16], sizes = [8, 8], strides = [1, 1]} : vector<16x96xf32> to vector<8x8xf32>
    %36 = vector.extract_strided_slice %28 {offsets = [8, 24], sizes = [8, 8], strides = [1, 1]} : vector<16x96xf32> to vector<8x8xf32>
    %37 = vector.shape_cast %29 : vector<8x8xf32> to vector<1x8x8xf32>
    %38 = vector.shape_cast %30 : vector<8x8xf32> to vector<1x8x8xf32>
    %39 = vector.shape_cast %31 : vector<8x8xf32> to vector<1x8x8xf32>
    %40 = vector.shape_cast %32 : vector<8x8xf32> to vector<1x8x8xf32>
    %41 = vector.shape_cast %33 : vector<8x8xf32> to vector<1x8x8xf32>
    %42 = vector.shape_cast %34 : vector<8x8xf32> to vector<1x8x8xf32>
    %43 = vector.shape_cast %35 : vector<8x8xf32> to vector<1x8x8xf32>
    %44 = vector.shape_cast %36 : vector<8x8xf32> to vector<1x8x8xf32>
    %45 = tpu.concatenate %37, %38, %39, %40, %41, %42, %43, %44 in 0 : vector<1x8x8xf32>, vector<1x8x8xf32>, vector<1x8x8xf32>, vector<1x8x8xf32>, vector<1x8x8xf32>, vector<1x8x8xf32>, vector<1x8x8xf32>, vector<1x8x8xf32> -> vector<8x8x8xf32>
    %46 = vector.extract_strided_slice %28 {offsets = [0, 32], sizes = [8, 8], strides = [1, 1]} : vector<16x96xf32> to vector<8x8xf32>
    %47 = vector.extract_strided_slice %28 {offsets = [0, 40], sizes = [8, 8], strides = [1, 1]} : vector<16x96xf32> to vector<8x8xf32>
    %48 = vector.extract_strided_slice %28 {offsets = [0, 48], sizes = [8, 8], strides = [1, 1]} : vector<16x96xf32> to vector<8x8xf32>
    %49 = vector.extract_strided_slice %28 {offsets = [0, 56], sizes = [8, 8], strides = [1, 1]} : vector<16x96xf32> to vector<8x8xf32>
    %50 = vector.extract_strided_slice %28 {offsets = [8, 32], sizes = [8, 8], strides = [1, 1]} : vector<16x96xf32> to vector<8x8xf32>
    %51 = vector.extract_strided_slice %28 {offsets = [8, 40], sizes = [8, 8], strides = [1, 1]} : vector<16x96xf32> to vector<8x8xf32>
    %52 = vector.extract_strided_slice %28 {offsets = [8, 48], sizes = [8, 8], strides = [1, 1]} : vector<16x96xf32> to vector<8x8xf32>
    %53 = vector.extract_strided_slice %28 {offsets = [8, 56], sizes = [8, 8], strides = [1, 1]} : vector<16x96xf32> to vector<8x8xf32>
    %54 = vector.shape_cast %46 : vector<8x8xf32> to vector<1x8x8xf32>
    %55 = vector.shape_cast %47 : vector<8x8xf32> to vector<1x8x8xf32>
    %56 = vector.shape_cast %48 : vector<8x8xf32> to vector<1x8x8xf32>
    %57 = vector.shape_cast %49 : vector<8x8xf32> to vector<1x8x8xf32>
    %58 = vector.shape_cast %50 : vector<8x8xf32> to vector<1x8x8xf32>
    %59 = vector.shape_cast %51 : vector<8x8xf32> to vector<1x8x8xf32>
    %60 = vector.shape_cast %52 : vector<8x8xf32> to vector<1x8x8xf32>
    %61 = vector.shape_cast %53 : vector<8x8xf32> to vector<1x8x8xf32>
    %62 = tpu.concatenate %54, %55, %56, %57, %58, %59, %60, %61 in 0 : vector<1x8x8xf32>, vector<1x8x8xf32>, vector<1x8x8xf32>, vector<1x8x8xf32>, vector<1x8x8xf32>, vector<1x8x8xf32>, vector<1x8x8xf32>, vector<1x8x8xf32> -> vector<8x8x8xf32>
    %63 = vector.extract_strided_slice %28 {offsets = [0, 64], sizes = [8, 8], strides = [1, 1]} : vector<16x96xf32> to vector<8x8xf32>
    %64 = vector.extract_strided_slice %28 {offsets = [0, 72], sizes = [8, 8], strides = [1, 1]} : vector<16x96xf32> to vector<8x8xf32>
    %65 = vector.extract_strided_slice %28 {offsets = [0, 80], sizes = [8, 8], strides = [1, 1]} : vector<16x96xf32> to vector<8x8xf32>
    %66 = vector.extract_strided_slice %28 {offsets = [0, 88], sizes = [8, 8], strides = [1, 1]} : vector<16x96xf32> to vector<8x8xf32>
    %67 = vector.extract_strided_slice %28 {offsets = [8, 64], sizes = [8, 8], strides = [1, 1]} : vector<16x96xf32> to vector<8x8xf32>
    %68 = vector.extract_strided_slice %28 {offsets = [8, 72], sizes = [8, 8], strides = [1, 1]} : vector<16x96xf32> to vector<8x8xf32>
    %69 = vector.extract_strided_slice %28 {offsets = [8, 80], sizes = [8, 8], strides = [1, 1]} : vector<16x96xf32> to vector<8x8xf32>
    %70 = vector.extract_strided_slice %28 {offsets = [8, 88], sizes = [8, 8], strides = [1, 1]} : vector<16x96xf32> to vector<8x8xf32>
    %71 = vector.shape_cast %63 : vector<8x8xf32> to vector<1x8x8xf32>
    %72 = vector.shape_cast %64 : vector<8x8xf32> to vector<1x8x8xf32>
    %73 = vector.shape_cast %65 : vector<8x8xf32> to vector<1x8x8xf32>
    %74 = vector.shape_cast %66 : vector<8x8xf32> to vector<1x8x8xf32>
    %75 = vector.shape_cast %67 : vector<8x8xf32> to vector<1x8x8xf32>
    %76 = vector.shape_cast %68 : vector<8x8xf32> to vector<1x8x8xf32>
    %77 = vector.shape_cast %69 : vector<8x8xf32> to vector<1x8x8xf32>
    %78 = vector.shape_cast %70 : vector<8x8xf32> to vector<1x8x8xf32>
    %79 = tpu.concatenate %71, %72, %73, %74, %75, %76, %77, %78 in 0 : vector<1x8x8xf32>, vector<1x8x8xf32>, vector<1x8x8xf32>, vector<1x8x8xf32>, vector<1x8x8xf32>, vector<1x8x8xf32>, vector<1x8x8xf32>, vector<1x8x8xf32> -> vector<8x8x8xf32>
    "tpu.trace_start"() <{level = 10 : i32, message = "gqd,gkd->gqk"}> : () -> ()
    %cst_14 = arith.constant dense<0.000000e+00> : vector<8x8x8xf32>
    %80 = tpu.matmul %45, %62, %cst_14 {dimension_numbers = #tpu.dot_dimension_numbers<[2], [2], [1], [1], [0, 0, 0, 1, 1, 1], [0], [0]>} : vector<8x8x8xf32>, vector<8x8x8xf32>, vector<8x8x8xf32> -> vector<8x8x8xf32>
    "tpu.trace_stop"() : () -> ()
    %c0_15 = arith.constant 0 : index
    %c0_16 = arith.constant 0 : index
    %c0_17 = arith.constant 0 : index
    %81 = vector.load %arg1[%c0_15, %c0_16, %c0_17] : memref<2x1x8xi32, #tpu.memory_space<vmem>>, vector<2x1x8xi32>
    %82 = arith.sitofp %81 : vector<2x1x8xi32> to vector<2x1x8xf32>
    %cst_18 = arith.constant 1.000000e+00 : f32
    %83 = vector.broadcast %cst_18 : f32 to vector<2x1x8xf32>
    %84 = arith.subf %83, %82 : vector<2x1x8xf32>
    %cst_19 = arith.constant -1.000000e+09 : f32
    %85 = vector.broadcast %cst_19 : f32 to vector<2x1x8xf32>
    %86 = arith.mulf %84, %85 : vector<2x1x8xf32>
    %87 = vector.extract_strided_slice %86 {offsets = [0, 0, 0], sizes = [1, 1, 8], strides = [1, 1, 1]} : vector<2x1x8xf32> to vector<1x1x8xf32>
    %88 = vector.shape_cast %87 : vector<1x1x8xf32> to vector<1x8xf32>
    %89 = vector.extract_strided_slice %86 {offsets = [0, 0, 0], sizes = [1, 1, 8], strides = [1, 1, 1]} : vector<2x1x8xf32> to vector<1x1x8xf32>
    %90 = vector.shape_cast %89 : vector<1x1x8xf32> to vector<1x8xf32>
    %91 = vector.extract_strided_slice %86 {offsets = [0, 0, 0], sizes = [1, 1, 8], strides = [1, 1, 1]} : vector<2x1x8xf32> to vector<1x1x8xf32>
    %92 = vector.shape_cast %91 : vector<1x1x8xf32> to vector<1x8xf32>
    %93 = vector.extract_strided_slice %86 {offsets = [0, 0, 0], sizes = [1, 1, 8], strides = [1, 1, 1]} : vector<2x1x8xf32> to vector<1x1x8xf32>
    %94 = vector.shape_cast %93 : vector<1x1x8xf32> to vector<1x8xf32>
    %95 = vector.extract_strided_slice %86 {offsets = [1, 0, 0], sizes = [1, 1, 8], strides = [1, 1, 1]} : vector<2x1x8xf32> to vector<1x1x8xf32>
    %96 = vector.shape_cast %95 : vector<1x1x8xf32> to vector<1x8xf32>
    %97 = vector.extract_strided_slice %86 {offsets = [1, 0, 0], sizes = [1, 1, 8], strides = [1, 1, 1]} : vector<2x1x8xf32> to vector<1x1x8xf32>
    %98 = vector.shape_cast %97 : vector<1x1x8xf32> to vector<1x8xf32>
    %99 = vector.extract_strided_slice %86 {offsets = [1, 0, 0], sizes = [1, 1, 8], strides = [1, 1, 1]} : vector<2x1x8xf32> to vector<1x1x8xf32>
    %100 = vector.shape_cast %99 : vector<1x1x8xf32> to vector<1x8xf32>
    %101 = vector.extract_strided_slice %86 {offsets = [1, 0, 0], sizes = [1, 1, 8], strides = [1, 1, 1]} : vector<2x1x8xf32> to vector<1x1x8xf32>
    %102 = vector.shape_cast %101 : vector<1x1x8xf32> to vector<1x8xf32>
    %103 = vector.shape_cast %88 : vector<1x8xf32> to vector<1x1x8xf32>
    %104 = vector.shape_cast %90 : vector<1x8xf32> to vector<1x1x8xf32>
    %105 = vector.shape_cast %92 : vector<1x8xf32> to vector<1x1x8xf32>
    %106 = vector.shape_cast %94 : vector<1x8xf32> to vector<1x1x8xf32>
    %107 = vector.shape_cast %96 : vector<1x8xf32> to vector<1x1x8xf32>
    %108 = vector.shape_cast %98 : vector<1x8xf32> to vector<1x1x8xf32>
    %109 = vector.shape_cast %100 : vector<1x8xf32> to vector<1x1x8xf32>
    %110 = vector.shape_cast %102 : vector<1x8xf32> to vector<1x1x8xf32>
    %111 = tpu.concatenate %103, %104, %105, %106, %107, %108, %109, %110 in 0 : vector<1x1x8xf32>, vector<1x1x8xf32>, vector<1x1x8xf32>, vector<1x1x8xf32>, vector<1x1x8xf32>, vector<1x1x8xf32>, vector<1x1x8xf32>, vector<1x1x8xf32> -> vector<8x1x8xf32>
    %112 = vector.broadcast %111 : vector<8x1x8xf32> to vector<8x8x8xf32>
    %113 = arith.addf %80, %112 : vector<8x8x8xf32>
    %cst_20 = arith.constant dense<0xFF800000> : vector<8x8xf32>
    %114 = vector.multi_reduction <maximumf>, %113, %cst_20 [2] : vector<8x8x8xf32> to vector<8x8xf32>
    %115 = vector.shape_cast %114 : vector<8x8xf32> to vector<8x8x1xf32>
    %116 = vector.broadcast %115 : vector<8x8x1xf32> to vector<8x8x8xf32>
    %117 = arith.subf %113, %116 : vector<8x8x8xf32>
    %118 = math.exp %117 : vector<8x8x8xf32>
    %cst_21 = arith.constant dense<0.000000e+00> : vector<8x8xf32>
    %119 = vector.multi_reduction <add>, %118, %cst_21 [2] : vector<8x8x8xf32> to vector<8x8xf32>
    %120 = vector.shape_cast %119 : vector<8x8xf32> to vector<8x8x1xf32>
    %121 = tpu.reciprocal %120 : vector<8x8x1xf32> -> vector<8x8x1xf32>
    %122 = vector.broadcast %121 : vector<8x8x1xf32> to vector<8x8x8xf32>
    %123 = arith.mulf %118, %122 : vector<8x8x8xf32>
    "tpu.trace_start"() <{level = 10 : i32, message = "gqk,gkd->gqd"}> : () -> ()
    %cst_22 = arith.constant dense<0.000000e+00> : vector<8x8x8xf32>
    %124 = tpu.matmul %123, %79, %cst_22 {dimension_numbers = #tpu.dot_dimension_numbers<[2], [1], [1], [2], [0, 0, 0, 1, 1, 2], [0], [0]>} : vector<8x8x8xf32>, vector<8x8x8xf32>, vector<8x8x8xf32> -> vector<8x8x8xf32>
    "tpu.trace_stop"() : () -> ()
    %125 = vector.extract_strided_slice %124 {offsets = [0, 0, 0], sizes = [1, 8, 8], strides = [1, 1, 1]} : vector<8x8x8xf32> to vector<1x8x8xf32>
    %126 = vector.shape_cast %125 : vector<1x8x8xf32> to vector<8x8xf32>
    %127 = vector.extract_strided_slice %124 {offsets = [1, 0, 0], sizes = [1, 8, 8], strides = [1, 1, 1]} : vector<8x8x8xf32> to vector<1x8x8xf32>
    %128 = vector.shape_cast %127 : vector<1x8x8xf32> to vector<8x8xf32>
    %129 = vector.extract_strided_slice %124 {offsets = [2, 0, 0], sizes = [1, 8, 8], strides = [1, 1, 1]} : vector<8x8x8xf32> to vector<1x8x8xf32>
    %130 = vector.shape_cast %129 : vector<1x8x8xf32> to vector<8x8xf32>
    %131 = vector.extract_strided_slice %124 {offsets = [3, 0, 0], sizes = [1, 8, 8], strides = [1, 1, 1]} : vector<8x8x8xf32> to vector<1x8x8xf32>
    %132 = vector.shape_cast %131 : vector<1x8x8xf32> to vector<8x8xf32>
    %133 = tpu.concatenate %126, %128, %130, %132 in 1 : vector<8x8xf32>, vector<8x8xf32>, vector<8x8xf32>, vector<8x8xf32> -> vector<8x32xf32>
    %134 = vector.extract_strided_slice %124 {offsets = [4, 0, 0], sizes = [1, 8, 8], strides = [1, 1, 1]} : vector<8x8x8xf32> to vector<1x8x8xf32>
    %135 = vector.shape_cast %134 : vector<1x8x8xf32> to vector<8x8xf32>
    %136 = vector.extract_strided_slice %124 {offsets = [5, 0, 0], sizes = [1, 8, 8], strides = [1, 1, 1]} : vector<8x8x8xf32> to vector<1x8x8xf32>
    %137 = vector.shape_cast %136 : vector<1x8x8xf32> to vector<8x8xf32>
    %138 = vector.extract_strided_slice %124 {offsets = [6, 0, 0], sizes = [1, 8, 8], strides = [1, 1, 1]} : vector<8x8x8xf32> to vector<1x8x8xf32>
    %139 = vector.shape_cast %138 : vector<1x8x8xf32> to vector<8x8xf32>
    %140 = vector.extract_strided_slice %124 {offsets = [7, 0, 0], sizes = [1, 8, 8], strides = [1, 1, 1]} : vector<8x8x8xf32> to vector<1x8x8xf32>
    %141 = vector.shape_cast %140 : vector<1x8x8xf32> to vector<8x8xf32>
    %142 = tpu.concatenate %135, %137, %139, %141 in 1 : vector<8x8xf32>, vector<8x8xf32>, vector<8x8xf32>, vector<8x8xf32> -> vector<8x32xf32>
    %143 = tpu.concatenate %133, %142 in 0 : vector<8x32xf32>, vector<8x32xf32> -> vector<16x32xf32>
    %c0_23 = arith.constant 0 : index
    %c0_24 = arith.constant 0 : index
    %144 = vector.load %arg4[%c0_23, %c0_24] : memref<32x32xf32, #tpu.memory_space<vmem>>, vector<32x32xf32>
    %cst_25 = arith.constant dense<0.000000e+00> : vector<16x32xf32>
    %145 = tpu.matmul %143, %144, %cst_25 {dimension_numbers = #tpu.dot_dimension_numbers<[1], [0], [0], [1], [0, 0, 1, 1], [], []>} : vector<16x32xf32>, vector<32x32xf32>, vector<16x32xf32> -> vector<16x32xf32>
    %c0_26 = arith.constant 0 : index
    %c0_27 = arith.constant 0 : index
    %146 = vector.load %arg5[%c0_26, %c0_27] : memref<1x32xf32, #tpu.memory_space<vmem>>, vector<1x32xf32>
    %147 = vector.broadcast %146 : vector<1x32xf32> to vector<16x32xf32>
    %148 = arith.addf %145, %147 : vector<16x32xf32>
    %149 = arith.addf %0, %148 : vector<16x32xf32>
    %c0_28 = arith.constant 0 : index
    %c0_29 = arith.constant 0 : index
    %150 = vector.load %arg12[%c0_28, %c0_29] : memref<1x32xf32, #tpu.memory_space<vmem>>, vector<1x32xf32>
    %c0_30 = arith.constant 0 : index
    %c0_31 = arith.constant 0 : index
    %151 = vector.load %arg13[%c0_30, %c0_31] : memref<1x32xf32, #tpu.memory_space<vmem>>, vector<1x32xf32>
    %cst_32 = arith.constant dense<0.000000e+00> : vector<16xf32>
    %152 = vector.multi_reduction <add>, %149, %cst_32 [1] : vector<16x32xf32> to vector<16xf32>
    %153 = vector.shape_cast %152 : vector<16xf32> to vector<16x1xf32>
    %cst_33 = arith.constant 3.200000e+01 : f32
    %154 = vector.broadcast %cst_33 : f32 to vector<16x1xf32>
    %155 = arith.divf %153, %154 : vector<16x1xf32>
    %156 = vector.broadcast %155 : vector<16x1xf32> to vector<16x32xf32>
    %157 = arith.subf %149, %156 : vector<16x32xf32>
    %158 = arith.mulf %157, %157 : vector<16x32xf32>
    %cst_34 = arith.constant dense<0.000000e+00> : vector<16xf32>
    %159 = vector.multi_reduction <add>, %158, %cst_34 [1] : vector<16x32xf32> to vector<16xf32>
    %160 = vector.shape_cast %159 : vector<16xf32> to vector<16x1xf32>
    %cst_35 = arith.constant 0.0322580636 : f32
    %161 = vector.broadcast %cst_35 : f32 to vector<16x1xf32>
    %162 = arith.mulf %160, %161 : vector<16x1xf32>
    %163 = math.sqrt %162 : vector<16x1xf32>
    %cst_36 = arith.constant 9.99999997E-7 : f32
    %164 = vector.broadcast %cst_36 : f32 to vector<16x1xf32>
    %165 = arith.addf %163, %164 : vector<16x1xf32>
    %166 = tpu.reciprocal %165 : vector<16x1xf32> -> vector<16x1xf32>
    %167 = vector.broadcast %150 : vector<1x32xf32> to vector<16x32xf32>
    %168 = vector.broadcast %166 : vector<16x1xf32> to vector<16x32xf32>
    %169 = arith.mulf %167, %168 : vector<16x32xf32>
    %170 = arith.mulf %157, %169 : vector<16x32xf32>
    %171 = vector.broadcast %151 : vector<1x32xf32> to vector<16x32xf32>
    %172 = arith.addf %170, %171 : vector<16x32xf32>
    %c0_37 = arith.constant 0 : index
    %c0_38 = arith.constant 0 : index
    %173 = vector.load %arg8[%c0_37, %c0_38] : memref<32x64xf32, #tpu.memory_space<vmem>>, vector<32x64xf32>
    %cst_39 = arith.constant dense<0.000000e+00> : vector<16x64xf32>
    %174 = tpu.matmul %172, %173, %cst_39 {dimension_numbers = #tpu.dot_dimension_numbers<[1], [0], [0], [1], [0, 0, 1, 1], [], []>} : vector<16x32xf32>, vector<32x64xf32>, vector<16x64xf32> -> vector<16x64xf32>
    %c0_40 = arith.constant 0 : index
    %c0_41 = arith.constant 0 : index
    %175 = vector.load %arg9[%c0_40, %c0_41] : memref<1x64xf32, #tpu.memory_space<vmem>>, vector<1x64xf32>
    %176 = vector.broadcast %175 : vector<1x64xf32> to vector<16x64xf32>
    %177 = arith.addf %174, %176 : vector<16x64xf32>
    %cst_42 = arith.constant 0.000000e+00 : f32
    %178 = vector.broadcast %cst_42 : f32 to vector<16x64xf32>
    %179 = arith.maximumf %177, %178 : vector<16x64xf32>
    %c0_43 = arith.constant 0 : index
    %c0_44 = arith.constant 0 : index
    %180 = vector.load %arg10[%c0_43, %c0_44] : memref<64x32xf32, #tpu.memory_space<vmem>>, vector<64x32xf32>
    %cst_45 = arith.constant dense<0.000000e+00> : vector<16x32xf32>
    %181 = tpu.matmul %179, %180, %cst_45 {dimension_numbers = #tpu.dot_dimension_numbers<[1], [0], [0], [1], [0, 0, 1, 1], [], []>} : vector<16x64xf32>, vector<64x32xf32>, vector<16x32xf32> -> vector<16x32xf32>
    %c0_46 = arith.constant 0 : index
    %c0_47 = arith.constant 0 : index
    %182 = vector.load %arg11[%c0_46, %c0_47] : memref<1x32xf32, #tpu.memory_space<vmem>>, vector<1x32xf32>
    %183 = vector.broadcast %182 : vector<1x32xf32> to vector<16x32xf32>
    %184 = arith.addf %181, %183 : vector<16x32xf32>
    %185 = arith.addf %149, %184 : vector<16x32xf32>
    %c0_48 = arith.constant 0 : index
    %c0_49 = arith.constant 0 : index
    %186 = vector.load %arg14[%c0_48, %c0_49] : memref<16x32xf32, #tpu.memory_space<vmem>>, vector<16x32xf32>
    tpu.vector_store %arg14[%c0_48, %c0_49], %185 {strides = array<i32>} : memref<16x32xf32, #tpu.memory_space<vmem>>, vector<16x32xf32>,
    return
  }
}

</mosaic_0001>

<bundles_post_ra>
// kernel: encoder_layer.1
= control target key start
LH: loop header
LB: loop body
LE: loop exit
PB: predicated region body
PF: predicated region fallthrough
CT: control target
= control target key end

     0   :  { %19 = vsyncpa [#allocation3], 0  ;;  %s2714_s0 = inlined_call_operand.hbm [shape: f32[16,32], index: 0, kind: input, shape index: {}]   ;;  %s2715_s1 = inlined_call_operand.vmem [shape: s32[2,1,8], index: 1, kind: input, shape index: {}]   ;;  %s2716_s2 = inlined_call_operand.vmem [shape: f32[32,96], index: 2, kind: input, shape index: {}]   ;;  %s2717_s3 = inlined_call_operand.vmem [shape: f32[1,96], index: 3, kind: input, shape index: {}]   ;;  %s2718_s4 = inlined_call_operand.vmem [shape: f32[32,32], index: 4, kind: input, shape index: {}]   ;;  %s2719_s5 = inlined_call_operand.vmem [shape: f32[1,32], index: 5, kind: input, shape index: {}]   ;;  %s2720_s6 = inlined_call_operand.vmem [shape: f32[1,32], index: 6, kind: input, shape index: {}]   ;;  %s2721_s7 = inlined_call_operand.vmem [shape: f32[1,32], index: 7, kind: input, shape index: {}]   ;;  %s2722_s8 = inlined_call_operand.vmem [shape: f32[32,64], index: 8, kind: input, shape index: {}]   ;;  %s2723_s9 = inlined_call_operand.hbm [shape: f32[1,64], index: 9, kind: input, shape index: {}]   ;;  %s2724_s10 = inlined_call_operand.vmem [shape: f32[64,32], index: 10, kind: input, shape index: {}]   ;;  %s2725_s11 = inlined_call_operand.vmem [shape: f32[1,32], index: 11, kind: input, shape index: {}]   ;;  %s2726_s12 = inlined_call_operand.vmem [shape: f32[1,32], index: 12, kind: input, shape index: {}]   ;;  %s2727_s13 = inlined_call_operand.vmem [shape: f32[1,32], index: 13, kind: input, shape index: {}]   ;;  %s2728_s14 = inlined_call_operand.hbm [shape: f32[16,32], index: 14, kind: output, shape index: {}]  }
   0x1   :  { %20 = vsyncpa [#allocation6], 0 }
   0x2   :  { %21 = vsyncpa [#allocation4], 0  ;;  %s2324_s29 = smov [#allocation2]  }
   0x3   :  { %s27_s30 = sshll.u32 %s2324_s29, 4  ;;  %s28_s30 = int_to_ptr.vmem [resolvable:$true] %s27_s30 }
   0x4   :  { %s2266_s15 = scalar_lea.vmem %s28_s30, 256  ;;  %p2271_p1 = scmp.lt.s32.totalorder %s28_s30, %s28_s30 }
   0x5   :  { %p2267_p0 = scmp.ne.s32.totalorder %s28_s30, %s2266_s15  ;;  %p2272_p2 = scmp.lt.s32.totalorder %s2266_s15, %s2266_s15 }
   0x7   :  { %p2273_p3 = por %p2272_p2, %p2271_p1 }
   0x9   :  { %p2274_p4 = pnand %p2273_p3, %p2267_p0 }
   0xb   :  { %2277 = shalt.err (!%p2274_p4)
}
   0xc   :  { %s2325_s16 = smov 128   ;;  %s2326_s17 = smov 8  }
   0xd   :  { %33 = dma.hbm_to_vmem [thread:$0]  %s2714_s0, 256, %s28_s30, [#allocation3], %s2325_s16, %s2325_s16, %s2326_s17  }
   0xe   :  { %s2327_s20 = smov [#allocation5]  }
   0xf   :  { %s56_s21 = sshll.u32 %s2327_s20, 4  ;;  %s57_s21 = int_to_ptr.vmem [resolvable:$true] %s56_s21 }
  0x10   :  { %s2286_s22 = scalar_lea.vmem %s57_s21, 16  ;;  %s2290_s23 = scalar_lea.vmem %s57_s21, 32 }
  0x11   :  { %p2287_p5 = scmp.ne.s32.totalorder %s57_s21, %s2286_s22  ;;  %p2291_p6 = scmp.lt.s32.totalorder %s57_s21, %s57_s21 }
  0x12   :  { %p2292_p7 = scmp.lt.s32.totalorder %s2290_s23, %s2286_s22 }
  0x14   :  { %p2293_p8 = por %p2292_p7, %p2291_p6 }
  0x16   :  { %p2294_p9 = pnand %p2293_p8, %p2287_p5 }
  0x18   :  { %2297 = shalt.err (!%p2294_p9)
}
  0x19   :  { %59 = dma.hbm_to_vmem [thread:$0]  %s2723_s9, 16, %s57_s21, [#allocation6]  }
  0x1a   :  { %2318 = dma.done.wait [#allocation3], 256  }
  0x1b   :  { %2319 = vsyncadd [#allocation3], 4294967040 }
  0x1c   :  { %2320 = dma.done.wait [#allocation6], 16  }
  0x1d   :  { %2321 = vsyncadd [#allocation6], 4294967280  ;;  %vm78_vm0 = vcmask 261120   ;;  %v2422_v0 = vld [vmem:[#allocation2] sm:$0xff]  ;;  %v2424_v1 = vld [vmem:[#allocation2 + $0x8] sm:$0xff]  ;;  %v2328_v44 = vmov 0.0  }
  0x1e   :  { %v79_v2 = vsel %vm78_vm0, %v2422_v0, 0.0  ;;  %v82_v3 = vsel %vm78_vm0, %v2424_v1, 0.0  ;;  %v139_v14 = vld [vmem:[%s2716_s2 + $0x18] sm:$0xff]  ;;  %v138_v15 = vld [vmem:[%s2716_s2 + $0x10] sm:$0xff]  ;;  %v137_v16 = vld [vmem:[%s2716_s2 + $0x8] sm:$0xff]  ;;  %2085 = vmatprep.subr.mxu0 %v2328_v44  ;;  %vm2329_vm5 = vmmov 0  }
  0x1f   :  { %80 = vadd.xlane.f32.xlu0 %v79_v2  ;;  %2064 = vmatprep.subr.mxu1 %v139_v14  ;;  %v136_v17 = vld [vmem:[%s2716_s2] sm:$0xff]  ;;  %s2331_s22 = smov 120   ;;  %s2332_s23 = smov 104   ;;  %vm264_vm6 = vcmask 64512   ;;  %vm1580_vm7 = vcmask 130048   ;;  %vm1582_vm8 = vcmask 195584  }
  0x20   :  { %2065 = vmatpush3.msra.mxu1 %v139_v14  ;;  %v1964_v34 = vld [vmem:[%s2720_s6] ss:$0 sm:$0xff]  ;;  %2087 = vmatprep.mubr.msk.f32.mxu0 %vm2329_vm5, %v2328_v44  ;;  %v243_v14 = vld [vmem:[%s2715_s1 + $0x1] sm:$0x1]  ;;  %s2335_s19 = smov 16   ;;  %s2336_s20 = smov 24  }
  0x21   :  { %2066 = vmatprep.subr.mxu1 %v138_v15  ;;  %v1965_v37 = vld [vmem:[%s2721_s7] ss:$0 sm:$0xff]  ;;  %s2330_s7 = smov 112   ;;  %vm1860_vm13 = vcmask 523264  }
  0x22   :  { %2067 = vmatpush3.msra.mxu1 %v138_v15  ;;  %v1966_v46 = vld [vmem:[%s2717_s3] ss:$0 sm:$0xff]  ;;  %s2333_s3 = smov 96   ;;  %v245_v15 = vcvt.s32.f32 %v243_v14 }
  0x23   :  { %83 = vadd.xlane.f32.xlu0 %v82_v3  ;;  %2068 = vmatprep.subr.mxu1 %v137_v16  ;;  %v242_v2 = vld [vmem:[%s2715_s1] sm:$0x1]  ;;  %s2334_s1 = smov 64  }
  0x24   :  { %2069 = vmatpush3.msra.mxu1 %v137_v16  ;;  %v244_v3 = vcvt.s32.f32 %v242_v2  ;;  %v247_v16 = vsub.f32 1.0, %v245_v15 }
  0x25   :  { %2070 = vmatprep.subr.mxu1 %v136_v17 }
  0x26   :  { %2071 = vmatpush3.msra.mxu1 %v136_v17  ;;  %v249_v17 = vmul.f32 -1e+09, %v247_v16 }
  0x27   :  { %2075 = vmatprep.subr.mxu1 %v2328_v44 }
  0xa8   :  { %v81_v4 = vpop.xlane.xlu0 %80 }
  0xa9   :  { %v86_v5 = vmul.f32 0.03125, %v81_v4  ;;  %v252_v4 = vlaneseq }
  0xab   :  { %v88_v6 = vsub.f32 %v2422_v0, %v86_v5  ;;  %v246_v5 = vsub.f32 1.0, %v244_v3 }
  0xac   :  { %v84_v7 = vpop.xlane.xlu0 %83 }
  0xad   :  { %v87_v8 = vmul.f32 0.03125, %v84_v7  ;;  %v90_v9 = vmul.f32 %v88_v6, %v88_v6  ;;  %v248_v7 = vmul.f32 -1e+09, %v246_v5 }
  0xaf   :  { %v89_v10 = vsub.f32 %v2424_v1, %v87_v8  ;;  %v92_v11 = vsel %vm78_vm0, %v90_v9, 0.0 }
  0xb0   :  { %93 = vadd.xlane.f32.xlu1 %v92_v11 }
  0xb1   :  { %v91_v12 = vmul.f32 %v89_v10, %v89_v10 }
  0xb3   :  { %v95_v13 = vsel %vm78_vm0, %v91_v12, 0.0 }
  0xb4   :  { %96 = vadd.xlane.f32.xlu1 %v95_v13 }
 0x139   :  { %v94_v18 = vpop.xlane.xlu1 %93 }
 0x13a   :  { %v98_v19 = vmul.f32 0.032258064, %v94_v18 }
 0x13c   :  { %2210 = vrsqrt.f32 %v98_v19  ;;  %vm102_vm1 = vcmp.eq.f32.partialorder %v98_v19, inf  ;;  %v105_v24 = vand.u32 2147483648, %v98_v19  ;;  %vm104_vm2 = vcmp.eq.f32.partialorder %v98_v19, 0.0 }
 0x13d   :  { %v97_v20 = vpop.xlane.xlu1 %96 }
 0x13e   :  { %v99_v21 = vmul.f32 0.032258064, %v97_v20 }
 0x140   :  { %2212 = vrsqrt.f32 %v99_v21  ;;  %vm109_vm3 = vcmp.eq.f32.partialorder %v99_v21, inf  ;;  %v112_v30 = vand.u32 2147483648, %v99_v21  ;;  %vm111_vm4 = vcmp.eq.f32.partialorder %v99_v21, 0.0 }
 0x149   :  { %v2211_v22 = vpop.eup %2210 }
 0x14a   :  { %v101_v23 = vmul.f32 %v2211_v22, %v98_v19 }
 0x14c   :  { %v103_v25 = vsel %vm102_vm1, %v98_v19, %v101_v23 }
 0x14d   :  { %v2213_v26 = vpop.eup %2212  ;;  %v106_v27 = vsel %vm104_vm2, %v105_v24, %v103_v25 }
 0x14e   :  { %v108_v28 = vmul.f32 %v2213_v26, %v99_v21  ;;  %v114_v29 = vadd.f32 1e-06, %v106_v27 }
 0x150   :  { %v110_v31 = vsel %vm109_vm3, %v99_v21, %v108_v28  ;;  %2214 = vrcp.f32 %v114_v29 }
 0x151   :  { %v113_v32 = vsel %vm111_vm4, %v112_v30, %v110_v31 }
 0x152   :  { %v115_v33 = vadd.f32 1e-06, %v113_v32 }
 0x154   :  { %2216 = vrcp.f32 %v115_v33 }
 0x15d   :  { %v2215_v35 = vpop.eup %2214 }
 0x15e   :  { %v124_v36 = vmul.f32 %v2215_v35, %v1964_v34 }
 0x160   :  { %v126_v38 = vmul.f32 %v124_v36, %v88_v6  ;;  %v253_v6 = vshrl.u32 %v252_v4, 7 }
 0x161   :  { %v2217_v39 = vpop.eup %2216 }
 0x162   :  { %v125_v40 = vmul.f32 %v2217_v39, %v1964_v34  ;;  %v134_v41 = vadd.f32 %v1965_v37, %v126_v38  ;;  %v254_v8 = vsub.s32 0, %v253_v6 }
 0x164   :  { %v127_v42 = vmul.f32 %v125_v40, %v89_v10  ;;  %2072 = vmatprep.mubr.msk.f32.mxu1 %vm78_vm0, %v134_v41  ;;  %v255_v9 = vrot.slane %v248_v7, %v254_v8  ;;  %v259_v26 = vrot.slane %v249_v17, %v254_v8 }
 0x166   :  { %v135_v43 = vadd.f32 %v1965_v37, %v127_v42 }
 0x168   :  { %2073 = vmatmul.mubr.msk.f32.vlgmr.msra.gmra.mxu1 %vm78_vm0, %v135_v43 }
 0x169   :  { %2077 = vmatprep.mubr.msk.f32.mxu1 %vm2329_vm5, %v2328_v44 }
 0x228   :  { %v2074_v45 = vpop.f32.mrf.mxu1 }
 0x229   :  { %v2467_v49 = vadd.f32 %v2074_v45, %v1966_v46 }
 0x22a   :  { %v219_v47 = vpop.f32.mrf.mxu1 }
 0x22b   :  { %v2463_v48 = vadd.f32 %v1966_v46, %v219_v47 }
 0x22d   :  { %231 = vrot.lane.b32.xlu1 %v2463_v48, %s2330_s7  ;;  %229 = vrot.lane.b32.xlu0 %v2463_v48, %s2331_s22 }
 0x231   :  { %233 = vrot.lane.b32.xlu1 %v2463_v48, %s2332_s23  ;;  %238 = vrot.lane.b32.xlu0 %v2467_v49, %s2330_s7 }
 0x235   :  { %236 = vrot.lane.b32.xlu1 %v2467_v49, %s2331_s22  ;;  %262 = vrot.lane.b32.xlu0 %v2463_v48, %s2333_s3 }
 0x239   :  { %240 = vrot.lane.b32.xlu1 %v2467_v49, %s2332_s23 }
 0x29f   :  { %v2474_v50 = vpop.permute.xlu1 %231  ;;  %v2476_v51 = vpop.permute.xlu0 %229 }
 0x2a0   :  { %415 = vrot.lane.b32.xlu0 %v2474_v50, %s2333_s3  ;;  %339 = vrot.lane.b32.xlu1 %v2476_v51, %s2333_s3 }
 0x2a3   :  { %v2480_v52 = vpop.permute.xlu1 %233  ;;  %v2482_v53 = vpop.permute.xlu0 %238 }
 0x2a4   :  { %567 = vrot.lane.b32.xlu0 %v2467_v49, %s2333_s3  ;;  %491 = vrot.lane.b32.xlu1 %v2480_v52, %s2333_s3 }
 0x2a7   :  { %v2486_v54 = vpop.permute.xlu1 %236  ;;  %v263_v55 = vpop.permute.xlu0 %262 }
 0x2a8   :  { %643 = vrot.lane.b32.xlu1 %v2486_v54, %s2333_s3  ;;  %719 = vrot.lane.b32.xlu0 %v2482_v53, %s2333_s3 }
 0x2a9   :  { %2076 = vmatpush3.xpose.msk.msra.mxu1 %vm264_vm6, %v263_v55 }
 0x2aa   :  { %2080 = vmatprep.subr.mxu1 %v2328_v44 }
 0x2ab   :  { %v2492_v56 = vpop.permute.xlu1 %240 }
 0x2ac   :  { %2078 = vmatmul.mubr.msk.f32.vlgmr.msra.gmra.mxu1 %vm264_vm6, %v2463_v48  ;;  %795 = vrot.lane.b32.xlu1 %v2492_v56, %s2333_s3 }
 0x2ad   :  { %2082 = vmatprep.mubr.msk.f32.mxu1 %vm2329_vm5, %v2328_v44 }
 0x312   :  { %v340_v57 = vpop.permute.xlu1 %339  ;;  %v416_v58 = vpop.permute.xlu0 %415 }
 0x313   :  { %2081 = vmatpush3.xpose.msk.msra.mxu1 %vm264_vm6, %v340_v57  ;;  %2086 = vmatpush3.xpose.msk.msra.mxu0 %vm264_vm6, %v416_v58 }
 0x314   :  { %2090 = vmatprep.subr.mxu1 %v2328_v44  ;;  %2095 = vmatprep.subr.mxu0 %v2328_v44 }
 0x316   :  { %v492_v59 = vpop.permute.xlu1 %491  ;;  %2083 = vmatmul.mubr.msk.f32.vlgmr.msra.gmra.mxu1 %vm264_vm6, %v2476_v51  ;;  %2088 = vmatmul.mubr.msk.f32.vlgmr.msra.gmra.mxu0 %vm264_vm6, %v2474_v50  ;;  %v568_v60 = vpop.permute.xlu0 %567 }
 0x317   :  { %2091 = vmatpush3.xpose.msk.msra.mxu1 %vm264_vm6, %v492_v59  ;;  %2096 = vmatpush3.xpose.msk.msra.mxu0 %vm264_vm6, %v568_v60 }
 0x318   :  { %2092 = vmatprep.mubr.msk.f32.mxu1 %vm2329_vm5, %v2328_v44  ;;  %2097 = vmatprep.mubr.msk.f32.mxu0 %vm2329_vm5, %v2328_v44 }
 0x319   :  { %2100 = vmatprep.subr.mxu1 %v2328_v44  ;;  %2105 = vmatprep.subr.mxu0 %v2328_v44 }
 0x31a   :  { %v644_v61 = vpop.permute.xlu1 %643  ;;  %2093 = vmatmul.mubr.msk.f32.vlgmr.msra.gmra.mxu1 %vm264_vm6, %v2480_v52  ;;  %2098 = vmatmul.mubr.msk.f32.vlgmr.msra.gmra.mxu0 %vm264_vm6, %v2467_v49  ;;  %v720_v62 = vpop.permute.xlu0 %719 }
 0x31b   :  { %2101 = vmatpush3.xpose.msk.msra.mxu1 %vm264_vm6, %v644_v61  ;;  %2106 = vmatpush3.xpose.msk.msra.mxu0 %vm264_vm6, %v720_v62 }
 0x31c   :  { %2102 = vmatprep.mubr.msk.f32.mxu1 %vm2329_vm5, %v2328_v44  ;;  %2107 = vmatprep.mubr.msk.f32.mxu0 %vm2329_vm5, %v2328_v44 }
 0x31d   :  { %2110 = vmatprep.subr.mxu1 %v2328_v44  ;;  %2115 = vmatprep.subr.mxu0 %v2328_v44 }
 0x31e   :  { %v796_v63 = vpop.permute.xlu1 %795  ;;  %2103 = vmatmul.mubr.msk.f32.vlgmr.msra.gmra.mxu1 %vm264_vm6, %v2486_v54  ;;  %2108 = vmatmul.mubr.msk.f32.vlgmr.msra.gmra.mxu0 %vm264_vm6, %v2482_v53 }
 0x31f   :  { %2111 = vmatpush3.xpose.msk.msra.mxu1 %vm264_vm6, %v796_v63  ;;  %2112 = vmatprep.mubr.msk.f32.mxu1 %vm2329_vm5, %v2328_v44 }
 0x320   :  { %2120 = vmatprep.subr.mxu1 %v2328_v44  ;;  %2117 = vmatprep.mubr.msk.f32.mxu0 %vm2329_vm5, %v2328_v44 }
 0x322   :  { %2113 = vmatmul.mubr.msk.f32.vlgmr.msra.gmra.mxu1 %vm264_vm6, %v2492_v56 }
 0x323   :  { %2122 = vmatprep.mubr.msk.f32.mxu1 %vm2329_vm5, %v2328_v44 }
 0x36c   :  { %v335_v10 = vpop.f32.mrf.mxu1 }
 0x36d   :  { %v336_v11 = vadd.f32 %v335_v10, %v255_v9 }
 0x36e   :  { %v2079_v12 = vpop.f32.mrf.mxu1 }
 0x36f   :  { %v871_v13 = vsel %vm264_vm6, %v336_v11, -inf }
 0x370   :  { %872 = vmax.xlane.f32.xlu0 %v871_v13 }
 0x3d6   :  { %v411_v18 = vpop.f32.mrf.mxu1  ;;  %v487_v19 = vpop.f32.mrf.mxu0 }
 0x3d7   :  { %v412_v20 = vadd.f32 %v411_v18, %v255_v9  ;;  %v488_v21 = vadd.f32 %v487_v19, %v255_v9 }
 0x3d8   :  { %v2084_v22 = vpop.f32.mrf.mxu1  ;;  %v2089_v23 = vpop.f32.mrf.mxu0 }
 0x3d9   :  { %v874_v24 = vsel %vm264_vm6, %v412_v20, -inf  ;;  %v877_v25 = vsel %vm264_vm6, %v488_v21, -inf }
 0x3da   :  { %875 = vmax.xlane.f32.xlu1 %v874_v24  ;;  %v563_v27 = vpop.f32.mrf.mxu1  ;;  %878 = vmax.xlane.f32.xlu0 %v877_v25  ;;  %v639_v28 = vpop.f32.mrf.mxu0 }
 0x3db   :  { %v564_v29 = vadd.f32 %v563_v27, %v255_v9  ;;  %v640_v32 = vadd.f32 %v639_v28, %v259_v26 }
 0x3dc   :  { %v2094_v30 = vpop.f32.mrf.mxu1  ;;  %v2099_v31 = vpop.f32.mrf.mxu0 }
 0x3dd   :  { %v880_v33 = vsel %vm264_vm6, %v564_v29, -inf  ;;  %v883_v41 = vsel %vm264_vm6, %v640_v32, -inf }
 0x3de   :  { %v715_v34 = vpop.f32.mrf.mxu1  ;;  %881 = vmax.xlane.f32.xlu0 %v880_v33  ;;  %v791_v35 = vpop.f32.mrf.mxu0 }
 0x3df   :  { %v716_v36 = vadd.f32 %v715_v34, %v259_v26  ;;  %v792_v39 = vadd.f32 %v791_v35, %v259_v26 }
 0x3e0   :  { %v2104_v37 = vpop.f32.mrf.mxu1  ;;  %v2109_v38 = vpop.f32.mrf.mxu0 }
 0x3e1   :  { %v886_v40 = vsel %vm264_vm6, %v716_v36, -inf  ;;  %v889_v47 = vsel %vm264_vm6, %v792_v39, -inf }
 0x3e2   :  { %887 = vmax.xlane.f32.xlu1 %v886_v40  ;;  %v867_v42 = vpop.f32.mrf.mxu1  ;;  %884 = vmax.xlane.f32.xlu0 %v883_v41 }
 0x3e3   :  { %v868_v43 = vadd.f32 %v867_v42, %v259_v26 }
 0x3e4   :  { %v2114_v45 = vpop.f32.mrf.mxu1 }
 0x3e5   :  { %v892_v46 = vsel %vm264_vm6, %v868_v43, -inf }
 0x3e6   :  { %893 = vmax.xlane.f32.xlu1 %v892_v46  ;;  %890 = vmax.xlane.f32.xlu0 %v889_v47 }
 0x3f7   :  { %1035 = vrot.lane.b32.xlu1 %v2476_v51, %s2334_s1 }
 0x3f9   :  { %v873_v55 = vpop.xlane.xlu0 %872 }
 0x3fa   :  { %v895_v57 = vsub.f32 %v336_v11, %v873_v55 }
 0x3fb   :  { %1111 = vrot.lane.b32.xlu1 %v2474_v50, %s2334_s1 }
 0x3fc   :  { %959 = vrot.lane.b32.xlu0 %v2463_v48, %s2334_s1  ;;  %v903_v58 = vmul.f32 1.442695, %v895_v57 }
 0x3fe   :  { %2218 = vpow2.f32 %v903_v58 }
 0x3ff   :  { %1187 = vrot.lane.b32.xlu1 %v2480_v52, %s2334_s1 }
 0x400   :  { %1263 = vrot.lane.b32.xlu0 %v2467_v49, %s2334_s1 }
 0x403   :  { %1339 = vrot.lane.b32.xlu1 %v2486_v54, %s2334_s1 }
 0x40b   :  { %v2567_v51 = vpop.eup %2218 }
 0x40c   :  { %v919_v50 = vsel %vm264_vm6, %v2567_v51, 0.0 }
 0x41f   :  { %920 = vadd.xlane.f32.xlu0 %v919_v50 }
 0x463   :  { %v876_v48 = vpop.xlane.xlu1 %875  ;;  %v879_v59 = vpop.xlane.xlu0 %878 }
 0x464   :  { %v896_v60 = vsub.f32 %v412_v20, %v876_v48  ;;  %v897_v52 = vsub.f32 %v488_v21, %v879_v59 }
 0x466   :  { %v905_v61 = vmul.f32 1.442695, %v896_v60  ;;  %v907_v62 = vmul.f32 1.442695, %v897_v52 }
 0x467   :  { %v882_v49 = vpop.xlane.xlu0 %881 }
 0x468   :  { %2220 = vpow2.f32 %v905_v61  ;;  %v898_v63 = vsub.f32 %v564_v29, %v882_v49 }
 0x469   :  { %2222 = vpow2.f32 %v907_v62 }
 0x46a   :  { %v909_v54 = vmul.f32 1.442695, %v898_v63 }
 0x46b   :  { %v888_v2 = vpop.xlane.xlu1 %887  ;;  %v885_v3 = vpop.xlane.xlu0 %884 }
 0x46c   :  { %2224 = vpow2.f32 %v909_v54  ;;  %v900_v4 = vsub.f32 %v716_v36, %v888_v2  ;;  %v899_v5 = vsub.f32 %v640_v32, %v885_v3  ;;  %v1602_v54 = vld [vmem:[%s2718_s4 + $0x18] sm:$0xff]  ;;  %v1601_v2 = vld [vmem:[%s2718_s4 + $0x10] sm:$0xff] }
 0x46e   :  { %v913_v6 = vmul.f32 1.442695, %v900_v4  ;;  %v911_v7 = vmul.f32 1.442695, %v899_v5  ;;  %v1599_v5 = vld [vmem:[%s2718_s4] sm:$0xff] }
 0x46f   :  { %v894_v8 = vpop.xlane.xlu1 %893  ;;  %v891_v9 = vpop.xlane.xlu0 %890 }
 0x470   :  { %2226 = vpow2.f32 %v913_v6  ;;  %v902_v10 = vsub.f32 %v868_v43, %v894_v8  ;;  %v901_v11 = vsub.f32 %v792_v39, %v891_v9 }
 0x471   :  { %2228 = vpow2.f32 %v911_v7 }
 0x472   :  { %v917_v12 = vmul.f32 1.442695, %v902_v10  ;;  %v915_v13 = vmul.f32 1.442695, %v901_v11 }
 0x473   :  { %v1036_v14 = vpop.permute.xlu1 %1035  ;;  %v960_v15 = vpop.permute.xlu0 %959 }
 0x474   :  { %2230 = vpow2.f32 %v917_v12  ;;  %2116 = vmatpush3.msra.mxu0 %v960_v15  ;;  %2121 = vmatpush3.msra.mxu1 %v1036_v14 }
 0x475   :  { %v2221_v16 = vpop.eup %2220  ;;  %2232 = vpow2.f32 %v915_v13  ;;  %2125 = vmatprep.subr.mxu0 %v2328_v44  ;;  %2130 = vmatprep.subr.mxu1 %v2328_v44 }
 0x476   :  { %v2223_v17 = vpop.eup %2222  ;;  %v922_v18 = vsel %vm264_vm6, %v2221_v16, 0.0 }
 0x477   :  { %923 = vadd.xlane.f32.xlu1 %v922_v18  ;;  %v925_v19 = vsel %vm264_vm6, %v2223_v17, 0.0  ;;  %v1264_v30 = vpop.permute.xlu0 %1263  ;;  %v1112_v34 = vpop.permute.xlu1 %1111 }
 0x478   :  { %926 = vadd.xlane.f32.xlu0 %v925_v19 }
 0x479   :  { %v2225_v20 = vpop.eup %2224 }
 0x47a   :  { %v928_v21 = vsel %vm264_vm6, %v2225_v20, 0.0 }
 0x47b   :  { %929 = vadd.xlane.f32.xlu1 %v928_v21  ;;  %v1188_v35 = vpop.permute.xlu1 %1187 }
 0x47d   :  { %v2227_v22 = vpop.eup %2226 }
 0x47e   :  { %v2229_v23 = vpop.eup %2228  ;;  %v934_v24 = vsel %vm264_vm6, %v2227_v22, 0.0 }
 0x47f   :  { %935 = vadd.xlane.f32.xlu1 %v934_v24  ;;  %v931_v25 = vsel %vm264_vm6, %v2229_v23, 0.0 }
 0x480   :  { %932 = vadd.xlane.f32.xlu0 %v931_v25 }
 0x481   :  { %v2578_v26 = vpop.eup %2230 }
 0x482   :  { %v2580_v27 = vpop.eup %2232  ;;  %v940_v28 = vsel %vm264_vm6, %v2578_v26, 0.0 }
 0x483   :  { %941 = vadd.xlane.f32.xlu1 %v940_v28  ;;  %v937_v29 = vsel %vm264_vm6, %v2580_v27, 0.0 }
 0x484   :  { %938 = vadd.xlane.f32.xlu0 %v937_v29 }
 0x494   :  { %1491 = vrot.lane.b32.xlu1 %v2492_v56, %s2334_s1  ;;  %v1340_v56 = vpop.permute.xlu1 %1339 }
 0x49a   :  { %1415 = vrot.lane.b32.xlu0 %v2482_v53, %s2334_s1 }
 0x4a8   :  { %v921_v31 = vpop.xlane.xlu0 %920 }
 0x4a9   :  { %2234 = vrcp.f32 %v921_v31 }
 0x4b6   :  { %v2235_v32 = vpop.eup %2234 }
 0x4b7   :  { %v951_v33 = vmul.f32 %v2235_v32, %v2567_v51 }
 0x4b9   :  { %2118 = vmatmul.mubr.msk.f32.vlgmr.msra.gmra.mxu0 %vm264_vm6, %v951_v33 }
 0x4ba   :  { %2126 = vmatpush3.msra.mxu0 %v1112_v34  ;;  %2127 = vmatprep.mubr.msk.f32.mxu0 %vm2329_vm5, %v2328_v44 }
 0x4bb   :  { %2135 = vmatprep.subr.mxu0 %v2328_v44 }
 0x500   :  { %v924_v36 = vpop.xlane.xlu1 %923 }
 0x501   :  { %2236 = vrcp.f32 %v924_v36  ;;  %v927_v53 = vpop.xlane.xlu0 %926 }
 0x502   :  { %2238 = vrcp.f32 %v927_v53 }
 0x504   :  { %v930_v37 = vpop.xlane.xlu1 %929 }
 0x505   :  { %2240 = vrcp.f32 %v930_v37 }
 0x508   :  { %v936_v38 = vpop.xlane.xlu1 %935 }
 0x509   :  { %2242 = vrcp.f32 %v936_v38  ;;  %v933_v39 = vpop.xlane.xlu0 %932 }
 0x50a   :  { %2244 = vrcp.f32 %v933_v39 }
 0x50c   :  { %v942_v40 = vpop.xlane.xlu1 %941 }
 0x50d   :  { %2246 = vrcp.f32 %v942_v40  ;;  %v939_v41 = vpop.xlane.xlu0 %938 }
 0x50e   :  { %v2237_v42 = vpop.eup %2236  ;;  %2248 = vrcp.f32 %v939_v41 }
 0x50f   :  { %v2239_v43 = vpop.eup %2238  ;;  %v952_v45 = vmul.f32 %v2237_v42, %v2221_v16 }
 0x510   :  { %v953_v46 = vmul.f32 %v2239_v43, %v2223_v17  ;;  %v1492_v48 = vpop.permute.xlu1 %1491 }
 0x511   :  { %2123 = vmatmul.mubr.msk.f32.vlgmr.msra.gmra.mxu1 %vm264_vm6, %v952_v45  ;;  %v1416_v60 = vpop.permute.xlu0 %1415 }
 0x512   :  { %v2241_v47 = vpop.eup %2240  ;;  %2128 = vmatmul.mubr.msk.f32.vlgmr.msra.gmra.mxu0 %vm264_vm6, %v953_v46  ;;  %2131 = vmatpush3.msra.mxu1 %v1188_v35  ;;  %v1754_v46 = vld [vmem:[%s2722_s8 + $0x18] sm:$0xff] }
 0x513   :  { %2136 = vmatpush3.msra.mxu0 %v1264_v30  ;;  %2132 = vmatprep.mubr.msk.f32.mxu1 %vm2329_vm5, %v2328_v44  ;;  %v954_v55 = vmul.f32 %v2241_v47, %v2225_v20  ;;  %v1993_v30 = vld [vmem:[%s2719_s5] ss:$0 sm:$0xff]  ;;  %v1753_v47 = vld [vmem:[%s2722_s8 + $0x10] sm:$0xff] }
 0x514   :  { %2140 = vmatprep.subr.mxu1 %v2328_v44  ;;  %2137 = vmatprep.mubr.msk.f32.mxu0 %vm2329_vm5, %v2328_v44 }
 0x515   :  { %2133 = vmatmul.mubr.msk.f32.vlgmr.msra.gmra.mxu1 %vm264_vm6, %v954_v55  ;;  %2145 = vmatprep.subr.mxu0 %v2328_v44  ;;  %v1752_v55 = vld [vmem:[%s2722_s8 + $0x8] sm:$0xff] }
 0x516   :  { %v2243_v57 = vpop.eup %2242  ;;  %2141 = vmatpush3.msra.mxu1 %v1340_v56  ;;  %2142 = vmatprep.mubr.msk.f32.mxu1 %vm2329_vm5, %v2328_v44 }
 0x517   :  { %v2245_v58 = vpop.eup %2244  ;;  %2150 = vmatprep.subr.mxu1 %v2328_v44  ;;  %v956_v51 = vmul.f32 %v2243_v57, %v2227_v22  ;;  %v1751_v57 = vld [vmem:[%s2722_s8] sm:$0xff] }
 0x518   :  { %v955_v50 = vmul.f32 %v2245_v58, %v2229_v23  ;;  %v1852_v58 = vld [vmem:[%s2724_s10 + $0x38] sm:$0xff] }
 0x519   :  { %2143 = vmatmul.mubr.msk.f32.vlgmr.msra.gmra.mxu1 %vm264_vm6, %v956_v51  ;;  %v1851_v51 = vld [vmem:[%s2724_s10 + $0x30] sm:$0xff] }
 0x51a   :  { %v2247_v59 = vpop.eup %2246  ;;  %2138 = vmatmul.mubr.msk.f32.vlgmr.msra.gmra.mxu0 %vm264_vm6, %v955_v50  ;;  %2151 = vmatpush3.msra.mxu1 %v1492_v48  ;;  %v1850_v50 = vld [vmem:[%s2724_s10 + $0x28] sm:$0xff]  ;;  %v1849_v48 = vld [vmem:[%s2724_s10 + $0x20] sm:$0xff] }
 0x51b   :  { %v2249_v52 = vpop.eup %2248  ;;  %2146 = vmatpush3.msra.mxu0 %v1416_v60  ;;  %2147 = vmatprep.mubr.msk.f32.mxu0 %vm2329_vm5, %v2328_v44  ;;  %v958_v61 = vmul.f32 %v2247_v59, %v2578_v26 }
 0x51c   :  { %2152 = vmatprep.mubr.msk.f32.mxu1 %vm2329_vm5, %v2328_v44  ;;  %v957_v62 = vmul.f32 %v2249_v52, %v2580_v27  ;;  %2155 = vmatprep.subr.mxu0 %v1602_v54  ;;  %v1600_v44 = vld [vmem:[%s2718_s4 + $0x8] sm:$0xff] }
 0x51d   :  { %2153 = vmatmul.mubr.msk.f32.vlgmr.msra.gmra.mxu1 %vm264_vm6, %v958_v61  ;;  %2166 = vmatprep.subr.mxu1 %v1754_v46 }
 0x51e   :  { %2148 = vmatmul.mubr.msk.f32.vlgmr.msra.gmra.mxu0 %vm264_vm6, %v957_v62  ;;  %2167 = vmatpush3.msra.mxu1 %v1754_v46 }
 0x51f   :  { %2156 = vmatpush3.msra.mxu0 %v1602_v54  ;;  %2168 = vmatprep.subr.mxu1 %v1753_v47 }
 0x520   :  { %2157 = vmatprep.subr.mxu0 %v1601_v2  ;;  %2169 = vmatpush3.msra.mxu1 %v1753_v47 }
 0x521   :  { %2158 = vmatpush3.msra.mxu0 %v1601_v2  ;;  %2170 = vmatprep.subr.mxu1 %v1752_v55 }
 0x522   :  { %2159 = vmatprep.subr.mxu0 %v1600_v44  ;;  %2171 = vmatpush3.msra.mxu1 %v1752_v55 }
 0x523   :  { %2160 = vmatpush3.msra.mxu0 %v1600_v44  ;;  %2172 = vmatprep.subr.mxu1 %v1751_v57 }
 0x524   :  { %2161 = vmatprep.subr.mxu0 %v1599_v5  ;;  %2173 = vmatpush3.msra.mxu1 %v1751_v57 }
 0x525   :  { %2162 = vmatpush3.msra.mxu0 %v1599_v5 }
 0x526   :  { %2177 = vmatprep.subr.mxu0 %v1852_v58 }
 0x579   :  { %v1031_v49 = vpop.f32.mrf.mxu0 }
 0x57b   :  { %v2119_v63 = vpop.f32.mrf.mxu0 }
 0x5d1   :  { %v1107_v3 = vpop.f32.mrf.mxu1 }
 0x5d2   :  { %v1183_v4 = vpop.f32.mrf.mxu0  ;;  %1568 = vrot.lane.b32.xlu0 %v1107_v3, %s2326_s17 }
 0x5d3   :  { %1572 = vrot.lane.b32.xlu1 %v1183_v4, %s2335_s19  ;;  %v2124_v6 = vpop.f32.mrf.mxu1 }
 0x5d4   :  { %v2129_v7 = vpop.f32.mrf.mxu0 }
 0x5d5   :  { %v1259_v8 = vpop.f32.mrf.mxu1 }
 0x5d7   :  { %1576 = vrot.lane.b32.xlu1 %v1259_v8, %s2336_s20  ;;  %v2134_v9 = vpop.f32.mrf.mxu1 }
 0x5d8   :  { %v1996_v9 = vld [vmem:[%s2726_s12] ss:$0 sm:$0xff] }
 0x5d9   :  { %v1411_v10 = vpop.f32.mrf.mxu1 }
 0x5da   :  { %v1335_v11 = vpop.f32.mrf.mxu0  ;;  %1585 = vrot.lane.b32.xlu0 %v1411_v10, %s2326_s17 }
 0x5db   :  { %v2144_v12 = vpop.f32.mrf.mxu1 }
 0x5dc   :  { %v2139_v13 = vpop.f32.mrf.mxu0  ;;  %v1997_v12 = vld [vmem:[%s2727_s13] ss:$0 sm:$0xff] }
 0x5dd   :  { %v1563_v14 = vpop.f32.mrf.mxu1 }
 0x5de   :  { %v1487_v15 = vpop.f32.mrf.mxu0  ;;  %1593 = vrot.lane.b32.xlu1 %v1563_v14, %s2336_s20 }
 0x5df   :  { %1589 = vrot.lane.b32.xlu0 %v1487_v15, %s2335_s19  ;;  %v2154_v16 = vpop.f32.mrf.mxu1 }
 0x5e0   :  { %v2149_v17 = vpop.f32.mrf.mxu0 }
 0x644   :  { %v1569_v18 = vpop.permute.xlu0 %1568 }
 0x645   :  { %v1573_v19 = vpop.permute.xlu1 %1572  ;;  %v1579_v20 = vsel %vm264_vm6, %v1031_v49, %v1569_v18 }
 0x646   :  { %v1581_v22 = vsel %vm1580_vm7, %v1579_v20, %v1573_v19  ;;  %v1848_v19 = vld [vmem:[%s2724_s10 + $0x18] sm:$0xff]  ;;  %v1847_v20 = vld [vmem:[%s2724_s10 + $0x10] sm:$0xff] }
 0x649   :  { %v1577_v21 = vpop.permute.xlu1 %1576 }
 0x64a   :  { %v1583_v23 = vsel %vm1582_vm8, %v1581_v22, %v1577_v21  ;;  %v1846_v21 = vld [vmem:[%s2724_s10 + $0x8] sm:$0xff]  ;;  %v1845_v22 = vld [vmem:[%s2724_s10] sm:$0xff]  ;;  %s2337_s10 = smov [#allocation7]  }
 0x64b   :  { %2163 = vmatprep.mubr.msk.f32.mxu0 %vm78_vm0, %v1583_v23  ;;  %v1998_v23 = vld [vmem:[#allocation5] ss:$0 sm:$0xff]  ;;  %s1951_s23 = sshll.u32 %s2337_s10, 4  ;;  %s1952_s23 = int_to_ptr.vmem [resolvable:$true] %s1951_s23 }
 0x64c   :  { %v1586_v24 = vpop.permute.xlu0 %1585  ;;  %s2298_s3 = scalar_lea.vmem %s1952_s23, 256  ;;  %p2303_p11 = scmp.lt.s32.totalorder %s1952_s23, %s1952_s23 }
 0x64d   :  { %v1596_v26 = vsel %vm264_vm6, %v1335_v11, %v1586_v24  ;;  %p2299_p10 = scmp.ne.s32.totalorder %s1952_s23, %s2298_s3  ;;  %p2304_p12 = scmp.lt.s32.totalorder %s2298_s3, %s2298_s3 }
 0x64f   :  { %p2305_p13 = por %p2304_p12, %p2303_p11 }
 0x650   :  { %v1594_v25 = vpop.permute.xlu1 %1593 }
 0x651   :  { %v1590_v27 = vpop.permute.xlu0 %1589  ;;  %p2306_p0 = pnand %p2305_p13, %p2299_p10 }
 0x652   :  { %v1597_v28 = vsel %vm1580_vm7, %v1596_v26, %v1590_v27 }
 0x653   :  { %v1598_v29 = vsel %vm1582_vm8, %v1597_v28, %v1594_v25 }
 0x654   :  { %2164 = vmatmul.mubr.msk.f32.vlgmr.msra.gmra.mxu0 %vm78_vm0, %v1598_v29 }
 0x655   :  { %2178 = vmatpush3.msra.mxu0 %v1852_v58 }
 0x656   :  { %2179 = vmatprep.subr.mxu0 %v1851_v51 }
 0x657   :  { %2180 = vmatpush3.msra.mxu0 %v1851_v51 }
 0x658   :  { %2181 = vmatprep.subr.mxu0 %v1850_v50 }
 0x659   :  { %2182 = vmatpush3.msra.mxu0 %v1850_v50 }
 0x65a   :  { %2183 = vmatprep.subr.mxu0 %v1849_v48 }
 0x65b   :  { %2184 = vmatpush3.msra.mxu0 %v1849_v48 }
 0x65c   :  { %2185 = vmatprep.subr.mxu0 %v1848_v19 }
 0x65d   :  { %2186 = vmatpush3.msra.mxu0 %v1848_v19 }
 0x65e   :  { %2187 = vmatprep.subr.mxu0 %v1847_v20 }
 0x65f   :  { %2188 = vmatpush3.msra.mxu0 %v1847_v20 }
 0x660   :  { %2189 = vmatprep.subr.mxu0 %v1846_v21 }
 0x661   :  { %2190 = vmatpush3.msra.mxu0 %v1846_v21 }
 0x662   :  { %2191 = vmatprep.subr.mxu0 %v1845_v22 }
 0x663   :  { %2192 = vmatpush3.msra.mxu0 %v1845_v22 }
 0x714   :  { %v2165_v31 = vpop.f32.mrf.mxu0 }
 0x715   :  { %v1688_v32 = vadd.f32 %v2165_v31, %v1993_v30 }
 0x716   :  { %v1682_v33 = vpop.f32.mrf.mxu0 }
 0x717   :  { %v2639_v34 = vadd.f32 %v1688_v32, %v2424_v1  ;;  %v1683_v35 = vadd.f32 %v1993_v30, %v1682_v33  ;;  %v2001_v30 = vld [vmem:[%s2725_s11] ss:$0 sm:$0xff] }
 0x719   :  { %v2642_v56 = vadd.f32 %v1683_v35, %v2422_v0  ;;  %v1698_v36 = vsel %vm78_vm0, %v2639_v34, 0.0 }
 0x71a   :  { %1699 = vadd.xlane.f32.xlu1 %v1698_v36 }
 0x71b   :  { %v1695_v53 = vsel %vm78_vm0, %v2642_v56, 0.0 }
 0x71c   :  { %1696 = vadd.xlane.f32.xlu0 %v1695_v53 }
 0x7a3   :  { %v1700_v37 = vpop.xlane.xlu1 %1699 }
 0x7a4   :  { %v1702_v38 = vmul.f32 0.03125, %v1700_v37 }
 0x7a5   :  { %v1697_v39 = vpop.xlane.xlu0 %1696 }
 0x7a6   :  { %v1701_v40 = vmul.f32 0.03125, %v1697_v39  ;;  %v2649_v41 = vsub.f32 %v2639_v34, %v1702_v38 }
 0x7a8   :  { %v1703_v1 = vsub.f32 %v2642_v56, %v1701_v40  ;;  %v1706_v43 = vmul.f32 %v2649_v41, %v2649_v41 }
 0x7aa   :  { %v1705_v42 = vmul.f32 %v1703_v1, %v1703_v1  ;;  %v1710_v45 = vsel %vm78_vm0, %v1706_v43, 0.0 }
 0x7ac   :  { %v1707_v0 = vsel %vm78_vm0, %v1705_v42, 0.0 }
 0x7ad   :  { %1708 = vadd.xlane.f32.xlu0 %v1707_v0 }
 0x7b1   :  { %1711 = vadd.xlane.f32.xlu0 %v1710_v45 }
 0x836   :  { %v1709_v59 = vpop.xlane.xlu0 %1708 }
 0x837   :  { %v1713_v60 = vmul.f32 0.032258064, %v1709_v59 }
 0x839   :  { %2250 = vrsqrt.f32 %v1713_v60  ;;  %vm1717_vm9 = vcmp.eq.f32.partialorder %v1713_v60, inf  ;;  %v1720_v63 = vand.u32 2147483648, %v1713_v60  ;;  %vm1719_vm10 = vcmp.eq.f32.partialorder %v1713_v60, 0.0 }
 0x83a   :  { %v1712_v52 = vpop.xlane.xlu0 %1711 }
 0x83b   :  { %v1714_v61 = vmul.f32 0.032258064, %v1712_v52 }
 0x83d   :  { %2252 = vrsqrt.f32 %v1714_v61  ;;  %vm1724_vm11 = vcmp.eq.f32.partialorder %v1714_v61, inf  ;;  %v1727_v5 = vand.u32 2147483648, %v1714_v61  ;;  %vm1726_vm12 = vcmp.eq.f32.partialorder %v1714_v61, 0.0 }
 0x846   :  { %v2251_v62 = vpop.eup %2250 }
 0x847   :  { %v1716_v49 = vmul.f32 %v2251_v62, %v1713_v60 }
 0x849   :  { %v1718_v54 = vsel %vm1717_vm9, %v1713_v60, %v1716_v49 }
 0x84a   :  { %v2253_v2 = vpop.eup %2252  ;;  %v1721_v44 = vsel %vm1719_vm10, %v1720_v63, %v1718_v54 }
 0x84b   :  { %v1729_v3 = vadd.f32 1e-06, %v1721_v44  ;;  %v1723_v4 = vmul.f32 %v2253_v2, %v1714_v61 }
 0x84d   :  { %2254 = vrcp.f32 %v1729_v3  ;;  %v1725_v6 = vsel %vm1724_vm11, %v1714_v61, %v1723_v4 }
 0x84e   :  { %v1728_v7 = vsel %vm1726_vm12, %v1727_v5, %v1725_v6 }
 0x84f   :  { %v1730_v8 = vadd.f32 1e-06, %v1728_v7 }
 0x851   :  { %2256 = vrcp.f32 %v1730_v8 }
 0x85a   :  { %v2255_v10 = vpop.eup %2254 }
 0x85b   :  { %v1739_v11 = vmul.f32 %v2255_v10, %v1996_v9 }
 0x85d   :  { %v1741_v13 = vmul.f32 %v1739_v11, %v1703_v1 }
 0x85e   :  { %v2257_v14 = vpop.eup %2256 }
 0x85f   :  { %v1740_v15 = vmul.f32 %v2257_v14, %v1996_v9  ;;  %v1749_v16 = vadd.f32 %v1997_v12, %v1741_v13 }
 0x861   :  { %v1742_v17 = vmul.f32 %v1740_v15, %v2649_v41  ;;  %2174 = vmatprep.mubr.msk.f32.mxu1 %vm78_vm0, %v1749_v16 }
 0x863   :  { %v1750_v18 = vadd.f32 %v1997_v12, %v1742_v17 }
 0x865   :  { %2175 = vmatmul.mubr.msk.f32.vlgmr.msra.gmra.mxu1 %vm78_vm0, %v1750_v18 }
 0x925   :  { %v2176_v24 = vpop.f32.mrf.mxu1 }
 0x926   :  { %v1840_v25 = vadd.f32 %v2176_v24, %v1998_v23 }
 0x927   :  { %v1834_v26 = vpop.f32.mrf.mxu1 }
 0x928   :  { %v1835_v27 = vadd.f32 %v1998_v23, %v1834_v26  ;;  %v1844_v29 = vmax.f32 %v1840_v25, 0.0 }
 0x92a   :  { %v1843_v28 = vmax.f32 %v1835_v27, 0.0 }
 0x92c   :  { %2193 = vmatprep.mubr.msk.f32.mxu0 %vm1860_vm13, %v1843_v28 }
 0x92d   :  { %2194 = vmatmul.mubr.msk.f32.vlgmr.msra.gmra.mxu0 %vm1860_vm13, %v1844_v29 }
 0x9ed   :  { %v2195_v31 = vpop.f32.mrf.mxu0 }
 0x9ee   :  { %v1939_v32 = vadd.f32 %v2195_v31, %v2001_v30 }
 0x9ef   :  { %v1933_v33 = vpop.f32.mrf.mxu0 }
 0x9f0   :  { %v1943_v35 = vadd.f32 %v1939_v32, %v2639_v34  ;;  %v1934_v36 = vadd.f32 %v2001_v30, %v1933_v33 }
 0x9f2   :  { %1945 = vst.msk [vmem:[#allocation7 + $0x8] sm:$0xff] %vm78_vm0, %v1943_v35  ;;  %v1942_v53 = vadd.f32 %v1934_v36, %v2642_v56 }
 0x9f4   :  { %1944 = vst.msk [vmem:[#allocation7] sm:$0xff] %vm78_vm0, %v1942_v53 }
 0x9f5   :  { %2309 = shalt.err (!%p2306_p0)
}
 0x9f6   :  { %1957 = dma.vmem_to_hbm [thread:$0]  %s1952_s23, 256, %s2728_s14, [#allocation4], %s2325_s16, %s2325_s16, %s2326_s17  }
 0x9f7   :  { %2322 = dma.done.wait [#allocation4], 256  }
 0x9f8   :  { %2323 = vsyncadd [#allocation4], 4294967040 }
 0x9f9   :  { %1961 = vsyncpa [#allocation3], 1 }
 0x9fa   :  { %1962 = vsyncpa [#allocation6], 1 }
 0x9fb   :  { %1963 = vsyncpa [#allocation4], 1 }

</bundles_post_ra>
